<compile_context>
chip_gen: v7x
topology: tpu7x:2x2x1
jax: 0.10.0
libtpu: 0.0.40
codegen_flags: <defaults>
</compile_context>

<pallas_src>
import functools

import jax
import jax.numpy as jnp
from jax.experimental import pallas as pl
from jax.experimental.pallas import tpu as pltpu

_LANE_WIDTH = 1024                    # block lane width (8 vregs wide, multiple of 128)
_ROW_ALIGN = 8                        # sublane alignment
_MAX_BLOCK_ELEMS = 512 * 1024         # ~2 MiB f32 per block per buffer
_MIN_PARALLEL_STEPS = 4               # keep >=4 grid steps for v7x dual-TensorCore
_SMALL_FALLBACK_ELEMS = 64 * 1024     # below this, plain fused XLA is already at roofline
_VMEM_LIMIT_BYTES = 32 * 1024 * 1024  # safe scoped-VMEM ceiling on v5e/v6e/v7x


def _lambda_kernel(x_ref, o_ref, *, func):
    # Elementwise hot path: the user func is traced here, lowered to VPU/EUP ops
    # over the whole VMEM tile.
    o_ref[...] = func(x_ref[...]).astype(o_ref.dtype)


class Lambda:
    """JAX/Pallas analogue of the PyTorch Lambda module.

    The streaming Pallas path covers single-argument, shape-preserving
    (elementwise) jnp-traceable callables; anything else falls back to calling
    `func` directly (identical semantics to the PyTorch module).
    """
    # TODO(synk): arbitrary Python callables (multi-arg, shape-changing, non-jnp)
    # cannot be generically lowered into a single Pallas kernel; those cases use
    # the plain-JAX fallback path below.

    def __init__(self, func):
        self.func = func

    def __call__(self, x):
        orig_shape = x.shape
        n = x.size

        # Abstract-eval the wrapped func to learn its output shape/dtype.
        out_abs = jax.eval_shape(self.func, jax.ShapeDtypeStruct(x.shape, x.dtype))
        elementwise = out_abs.shape == tuple(orig_shape)

        # Tiny or non-elementwise inputs: plain call (avoids a regression path).
        if (not elementwise) or n < _SMALL_FALLBACK_ELEMS:
            return self.func(x)

        out_dtype = out_abs.dtype
        flat = x.reshape(-1)  # contiguous flatten: no HBM copy

        # Lane-dense slab sizing.  Blocks are (block_rows, 1024) with
        # block_rows a multiple of 8, capped at ~2 MiB (f32), and chosen so the
        # grid keeps >= _MIN_PARALLEL_STEPS steps for megacore sharding.
        total_rows = (n // _LANE_WIDTH) // _ROW_ALIGN * _ROW_ALIGN
        max_block_rows = _MAX_BLOCK_ELEMS // _LANE_WIDTH
        block_rows = min(
            max_block_rows,
            max(_ROW_ALIGN,
                (total_rows // _MIN_PARALLEL_STEPS) // _ROW_ALIGN * _ROW_ALIGN),
        )
        grid_steps = total_rows // block_rows
        kernel_rows = grid_steps * block_rows
        bulk_n = kernel_rows * _LANE_WIDTH
        rem_n = n - bulk_n

        bulk = flat if rem_n == 0 else flat[:bulk_n]
        slab = bulk.reshape(kernel_rows, _LANE_WIDTH)

        kernel = functools.partial(_lambda_kernel, func=self.func)
        out2d = pl.pallas_call(
            kernel,
            out_shape=jax.ShapeDtypeStruct((kernel_rows, _LANE_WIDTH), out_dtype),
            grid_spec=pltpu.PrefetchScalarGridSpec(
                num_scalar_prefetch=0,
                grid=(grid_steps,),
                in_specs=[pl.BlockSpec((block_rows, _LANE_WIDTH), lambda i: (i, 0))],
                out_specs=pl.BlockSpec((block_rows, _LANE_WIDTH), lambda i: (i, 0)),
            ),
            compiler_params=pltpu.CompilerParams(
                dimension_semantics=("parallel",),
                vmem_limit_bytes=_VMEM_LIMIT_BYTES,
            ),
        )(slab)

        y = out2d.reshape(-1)
        if rem_n:
            # Small misaligned tail (< one block + 8 KiB): plain XLA elementwise,
            # no padding -> no func applied to fake zero elements.
            y = jnp.concatenate([y, self.func(flat[bulk_n:])])
        return y.reshape(orig_shape)


def _example_func(x):
    # A representative elementwise lambda one would wrap in Lambda(...):
    # gelu(x) * 2 + 1   (exp/tanh on the EUP, muls/adds on the VPU)
    return jax.nn.gelu(x) * 2.0 + 1.0


if __name__ == "__main__":
    key = jax.random.PRNGKey(0)
    k1, k2 = jax.random.split(key)
    module = Lambda(_example_func)

    # Small NCHW input consistent with a conv-style pipeline (fast-path).
    x_small = jax.random.normal(key, (2, 4, 16, 16), dtype=jnp.float32)
    y_small = jax.block_until_ready(module(x_small))
    assert y_small.shape == x_small.shape
    assert jnp.allclose(y_small, _example_func(x_small), atol=1e-5, rtol=1e-5)

    # Medium NCHW input: exercises the Pallas streaming kernel (aligned path).
    x_med = jax.random.normal(k1, (4, 16, 64, 64), dtype=jnp.float32)
    y_med = jax.block_until_ready(module(x_med))
    assert y_med.shape == x_med.shape
    assert jnp.allclose(y_med, _example_func(x_med), atol=1e-5, rtol=1e-5)

    # Misaligned input: exercises kernel-bulk + remainder path (no padding).
    x_odd = jax.random.normal(k2, (2, 3, 100, 128), dtype=jnp.float32)
    y_odd = jax.block_until_ready(module(x_odd))
    assert y_odd.shape == x_odd.shape
    assert jnp.allclose(y_odd, _example_func(x_odd), atol=1e-5, rtol=1e-5)

    print("KERNEL_OK")
</pallas_src>

<mosaic_0001>
module attributes {stable_mosaic.version = 11 : i64} {
  func.func @_lambda_kernel(%arg0: i32, %arg1: memref<64x1024xf32, #tpu.memory_space<vmem>>, %arg2: memref<64x1024xf32, #tpu.memory_space<vmem>>) attributes {dimension_semantics = [#tpu.dimension_semantics<parallel>], iteration_bounds = array<i64: 4>, scalar_prefetch = 0 : i64, scratch_operands = 0 : i64, tpu.core_type = #tpu.core_type<tc>, window_params = [{transform_indices = @transform_0, window_bounds = array<i64: 64, 1024>}, {transform_indices = @transform_1, window_bounds = array<i64: 64, 1024>}]} {
    %c0 = arith.constant 0 : index
    %c0_0 = arith.constant 0 : index
    %0 = vector.load %arg1[%c0, %c0_0] : memref<64x1024xf32, #tpu.memory_space<vmem>>, vector<64x1024xf32>
    %1 = arith.mulf %0, %0 : vector<64x1024xf32>
    %2 = arith.mulf %0, %1 : vector<64x1024xf32>
    %cst = arith.constant 4.471500e-02 : f32
    %3 = vector.broadcast %cst : f32 to vector<64x1024xf32>
    %4 = arith.mulf %3, %2 : vector<64x1024xf32>
    %5 = arith.addf %0, %4 : vector<64x1024xf32>
    %cst_1 = arith.constant 0.797884583 : f32
    %6 = vector.broadcast %cst_1 : f32 to vector<64x1024xf32>
    %7 = arith.mulf %6, %5 : vector<64x1024xf32>
    %8 = math.tanh %7 : vector<64x1024xf32>
    %cst_2 = arith.constant 1.000000e+00 : f32
    %9 = vector.broadcast %cst_2 : f32 to vector<64x1024xf32>
    %10 = arith.addf %9, %8 : vector<64x1024xf32>
    %cst_3 = arith.constant 5.000000e-01 : f32
    %11 = vector.broadcast %cst_3 : f32 to vector<64x1024xf32>
    %12 = arith.mulf %11, %10 : vector<64x1024xf32>
    %13 = arith.mulf %0, %12 : vector<64x1024xf32>
    %cst_4 = arith.constant 2.000000e+00 : f32
    %14 = vector.broadcast %cst_4 : f32 to vector<64x1024xf32>
    %15 = arith.mulf %13, %14 : vector<64x1024xf32>
    %cst_5 = arith.constant 1.000000e+00 : f32
    %16 = vector.broadcast %cst_5 : f32 to vector<64x1024xf32>
    %17 = arith.addf %15, %16 : vector<64x1024xf32>
    %c0_6 = arith.constant 0 : index
    %c0_7 = arith.constant 0 : index
    %18 = vector.load %arg2[%c0_6, %c0_7] : memref<64x1024xf32, #tpu.memory_space<vmem>>, vector<64x1024xf32>
    tpu.vector_store %arg2[%c0_6, %c0_7], %17 {strides = array<i32>} : memref<64x1024xf32, #tpu.memory_space<vmem>>, vector<64x1024xf32>,
    return
  }
  func.func @transform_0(%arg0: i32) -> (i32, i32) {
    %c0_i32 = arith.constant 0 : i32
    %c0_i32_0 = arith.constant 0 : i32
    return %arg0, %c0_i32 : i32, i32
  }
  func.func @transform_1(%arg0: i32) -> (i32, i32) {
    %c0_i32 = arith.constant 0 : i32
    %c0_i32_0 = arith.constant 0 : i32
    return %arg0, %c0_i32 : i32, i32
  }
}

</mosaic_0001>

<bundles_post_ra>
// kernel: tpu_custom_call.1
= control target key start
LH: loop header
LB: loop body
LE: loop exit
PB: predicated region body
PF: predicated region fallthrough
CT: control target
= control target key end

     0   :  { %6 = vsyncpa [#allocation3], 0  ;;  %s2121_s0 = inlined_call_operand.hbm [shape: f32[256,1024], index: 0, kind: input, shape index: {}]   ;;  %s2122_s1 = inlined_call_operand.hbm [shape: f32[256,1024], index: 1, kind: output, shape index: {}]  }
   0x1   :  { %8 = vsyncpa [#allocation3 + $0x1], 0 }
   0x2   :  { %9 = vsyncpa [#allocation4], 0 }
   0x3   :  { %11 = vsyncpa [#allocation4 + $0x1], 0  ;;  %s1370_s6 = smov 0   ;;  %s1372_s7 = smov 0  }
   0x4   :  { %s1374_s8 = smov 0   ;;  %s1376_s9 = smov 0  }
   0x5 LB: > { %s1391_s10 = sadd.s32 4294967295, %s1352_s9   ;;  %s1058_s11 = sadd.s32 4294967294, %s1352_s9   ;;  %s1352_s9 = sphi %s1376_s9, %s2134_s9   ;;  %s1348_s8 = sphi %s1374_s8, %s2133_s8   ;;  %s1344_s7 = sphi %s1372_s7, %s2132_s7   ;;  %s1340_s6 = sphi %s1370_s6, %s2131_s6  }
   0x6   : > { %s1395_s12 = sadd.s32 1, %s1352_s9   ;;  %s24_s13 = sadd.s32 1, %s1348_s8 }
   0x7   : > { %s21_s14 = ssub.s32 %s1352_s9, %s1395_s12  ;;  %p31_p0 = scmp.ne.s32.totalorder %s1348_s8, %s1344_s7 }
   0x8   : > { %p22_p1 = scmp.eq.s32.totalorder %s21_s14, 0  ;;  %p32_p2 = scmp.eq.s32.totalorder %s1352_s9, 0 }
   0x9   : > { %p37_p3 = scmp.ne.s32.totalorder %s1344_s7, %s1340_s6  ;;  %p38_p4 = scmp.eq.s32.totalorder %s1391_s10, 0 }
   0xa   : > { %s1407_s15 = scalar_select %p22_p1, %s1348_s8, %s24_s13  }
   0xb   : > { %p1409_p5 = por %p32_p2, %p31_p0  ;;  %p1413_p6 = por %p38_p4, %p37_p3 }
   0xc   : > { %p61_p7 = scmp.eq.s32.totalorder %s1391_s10, 3  ;;  %p67_p8 = scmp.eq.s32.totalorder %s1058_s11, 3 }
   0xd   : > { %p1090_p9 = scmp.lt.s32.totalorder %s1352_s9, 4  ;;  %s87_s20 = sand.u32 1, %s1348_s8  }
   0xe   : > { %p1419_p10 = por %p61_p7, %p31_p0  ;;  %p1423_p11 = por %p67_p8, %p37_p3 }
   0xf   : > { %s1075_s21 = sshll.u32 %s1352_s9, 13  ;;  %s1061_s22 = sshll.u32 %s87_s20, 9 }
  0x10   : > { %s2126_s18 = scalar_select %p1419_p10, 1, 0 }
  0x11   : > { %s2127_s19 = scalar_select %p1423_p11, 1, 0 }
  0x12   : > { %s1432_s25 = scalar_lea.hbm %s2121_s0, %s1075_s21  ;;  %s91_s26 = scalar_lea.vmem [#allocation2], %s1061_s22 }
  0x13   : > { %s99_s27 = sshll.u32 %s91_s26, 4  ;;  %p1436_p12 = pnand %p1090_p9, %p1409_p5  ;;  %s1440_s27 = int_to_ptr.vmem [resolvable:$true] %s99_s27 }
  0x14   : > { %s1442_s29 = scalar_lea.sflag [#allocation3], %s87_s20  ;;  %s1256_s30 = scalar_lea.hbm %s1432_s25, 8192 }
  0x15   : > { %p1257_p13 = scmp.ne.s32.totalorder %s1432_s25, %s1256_s30  ;;  %p1258_p0 = pneg %p1436_p12 }
  0x16   : > { %s1261_s4 = scalar_lea.hbm %s2121_s0, 32768  ;;  %p1262_p3 = scmp.lt.u32.totalorder %s1432_s25, %s2121_s0 }
  0x17   : > { %p1259_p1 = pnand %p1258_p0, %p1257_p13  ;;  %p1263_p4 = scmp.lt.u32.totalorder %s1261_s4, %s1256_s30 }
  0x18   : > { %p1265_p7 = scmp.lt.u32.totalorder %s1256_s30, %s1432_s25 }
  0x19   : > { %p1260_p2 = pneg %p1259_p1  ;;  %p1264_p5 = por %p1263_p4, %p1262_p3 }
  0x1b   : > { %p1266_p8 = por %p1265_p7, %p1264_p5 }
  0x1d   : > { %p1267_p9 = pnand %p1266_p8, %p1260_p2 }
  0x1f   : > { %1270 = shalt.err (!%p1267_p9)
}
  0x20   : > { %s1271_s13 = scalar_lea.vmem %s1440_s27, 8192  ;;  %s1354_s14 = smov [#allocation2]  }
  0x21   : > { %p1272_p13 = scmp.ne.s32.totalorder %s1440_s27, %s1271_s13  ;;  %s1276_s16 = sshll.u32 %s1354_s14, 4  ;;  %s1277_s16 = int_to_ptr.vmem [resolvable:$false] %s1276_s16 }
  0x22   : > { %s1278_s20 = scalar_lea.vmem %s1277_s16, 16384  ;;  %p1279_p10 = scmp.lt.s32.totalorder %s1440_s27, %s1277_s16 }
  0x23   : > { %p1274_p1 = pnand %p1272_p13, %p1258_p0  ;;  %p1280_p3 = scmp.lt.s32.totalorder %s1278_s20, %s1271_s13 }
  0x25   : > { %p1275_p11 = pneg %p1274_p1  ;;  %p1281_p4 = por %p1280_p3, %p1279_p10 }
  0x27   : > { %p1282_p5 = pnand %p1281_p4, %p1275_p11 }
  0x29   : > { %1285 = shalt.err (!%p1282_p5)
}
  0x2a   : > { %s1355_s21 = smov 1024   ;;  %s1356_s22 = smov 64  }
  0x2b   : > { %1085 = dma.hbm_to_vmem [thread:$0]  (!%p1436_p12), %s1432_s25, 8192, %s1440_s27, %s1442_s29, %s1355_s21, %s1355_s21, %s1356_s22  }
  0x2c   : > { %p1065_p0 = scmp.ge.s32.totalorder %s1352_s9, 1  ;;  %p107_p2 = scmp.lt.s32.totalorder %s1352_s9, 5 }
  0x2e   : > { %p108_p7 = pnand %p1065_p0, %p107_p2 }
  0x2f   : > { %s1473_s23 = sand.u32 (!%p108_p7), 1, %s1344_s7  }
  0x30   : > { %111 = sbr.rel (%p108_p7) target bundleno = 265 (0x109), region = 24  ;;  %s1066_s24 = sshll.u32 (!%p108_p7), %s1473_s23, 9 }
  0x31   : > { %s114_s26 = scalar_lea.sflag (!%p108_p7), [#allocation3], %s1473_s23  ;;  %s1479_s30 = scalar_lea.vmem (!%p108_p7), [#allocation2], %s1066_s24 }
  0x37   : > { %1331 = dma.done.wait (%p1413_p6), %s114_s26, 8192  }
  0x38   : > { %1333 = vsyncadd (%p1413_p6), %s114_s26, 4294959104  ;;  %v1486_v0 = vld [vmem:[%s1479_s30] sm:$0xff]  ;;  %v1489_v1 = vld [vmem:[%s1479_s30 + $0x8] sm:$0xff]  ;;  %s1614_s17 = scalar_lea.vmem [#allocation5], %s1066_s24  ;;  %s1077_s25 = sshll.u32 %s1391_s10, 13 }
  0x39   : > { %v1492_v2 = vld [vmem:[%s1479_s30 + $0x10] sm:$0xff]  ;;  %v202_v3 = vmul.f32 %v1486_v0, %v1486_v0  ;;  %v203_v4 = vmul.f32 %v1489_v1, %v1489_v1  ;;  %v1501_v6 = vld [vmem:[%s1479_s30 + $0x18] sm:$0xff]  ;;  %v1504_v7 = vld [vmem:[%s1479_s30 + $0x20] sm:$0xff]  ;;  %s985_s27 = sshll.u32 %s1614_s17, 4  ;;  %s2074_s2 = scalar_lea.hbm %s2122_s1, %s1077_s25  ;;  %s2076_s27 = int_to_ptr.vmem [resolvable:$true] %s985_s27 }
  0x3a   : > { %v204_v5 = vmul.f32 %v1492_v2, %v1492_v2  ;;  %v1507_v8 = vld [vmem:[%s1479_s30 + $0x28] sm:$0xff]  ;;  %v205_v9 = vmul.f32 %v1501_v6, %v1501_v6  ;;  %v206_v10 = vmul.f32 %v1504_v7, %v1504_v7  ;;  %v1516_v12 = vld [vmem:[%s1479_s30 + $0x30] sm:$0xff]  ;;  %v1519_v13 = vld [vmem:[%s1479_s30 + $0x38] sm:$0xff]  ;;  %s971_s3 = scalar_lea.sflag [#allocation4], %s1473_s23  ;;  %s1286_s4 = scalar_lea.vmem %s2076_s27, 8192 }
  0x3b   : > { %v207_v11 = vmul.f32 %v1507_v8, %v1507_v8  ;;  %v266_v14 = vmul.f32 %v202_v3, %v1486_v0  ;;  %v267_v15 = vmul.f32 %v203_v4, %v1489_v1  ;;  %v208_v17 = vmul.f32 %v1516_v12, %v1516_v12  ;;  %v1537_v34 = vld [vmem:[%s1479_s30 + $0x40] sm:$0xff]  ;;  %v1540_v35 = vld [vmem:[%s1479_s30 + $0x48] sm:$0xff]  ;;  %v1546_v40 = vld [vmem:[%s1479_s30 + $0x50] sm:$0xff]  ;;  %p1287_p6 = scmp.ne.s32.totalorder %s2076_s27, %s1286_s4  ;;  %p2129_p10 = scmp.ne.s32.totalorder %s2126_s18, 0 }
  0x3c   : > { %v268_v16 = vmul.f32 %v204_v5, %v1492_v2  ;;  %v269_v18 = vmul.f32 %v205_v9, %v1501_v6  ;;  %v270_v19 = vmul.f32 %v206_v10, %v1504_v7  ;;  %v209_v21 = vmul.f32 %v1519_v13, %v1519_v13  ;;  %v1549_v41 = vld [vmem:[%s1479_s30 + $0x58] sm:$0xff]  ;;  %v1552_v42 = vld [vmem:[%s1479_s30 + $0x60] sm:$0xff]  ;;  %v1561_v54 = vld [vmem:[%s1479_s30 + $0x68] sm:$0xff]  ;;  %s1357_s10 = smov [#allocation5]  }
  0x3d   : > { %v271_v20 = vmul.f32 %v207_v11, %v1507_v8  ;;  %v330_v22 = vmul.f32 0.044715, %v266_v14  ;;  %v331_v23 = vmul.f32 0.044715, %v267_v15  ;;  %v272_v25 = vmul.f32 %v208_v17, %v1516_v12  ;;  %v1578_v14 = vld [vmem:[%s1479_s30 + $0x70] sm:$0xff]  ;;  %p1288_p11 = pnand %p1287_p6, %p2129_p10  ;;  %s1290_s5 = sshll.u32 %s1357_s10, 4  ;;  %s1291_s5 = int_to_ptr.vmem [resolvable:$false] %s1290_s5 }
  0x3e   : > { %v332_v24 = vmul.f32 0.044715, %v268_v16  ;;  %v333_v26 = vmul.f32 0.044715, %v269_v18  ;;  %v334_v27 = vmul.f32 0.044715, %v270_v19  ;;  %v273_v29 = vmul.f32 %v209_v21, %v1519_v13  ;;  %p1293_p8 = scmp.lt.s32.totalorder %s2076_s27, %s1291_s5 }
  0x3f   : > { %v335_v28 = vmul.f32 0.044715, %v271_v20  ;;  %v394_v30 = vadd.f32 %v330_v22, %v1486_v0  ;;  %v395_v31 = vadd.f32 %v331_v23, %v1489_v1  ;;  %v336_v33 = vmul.f32 0.044715, %v272_v25  ;;  %v1583_v18 = vld [vmem:[%s1479_s30 + $0x78] sm:$0xff]  ;;  %v1588_v22 = vld [vmem:[%s1479_s30 + $0x80] sm:$0xff]  ;;  %p1289_p12 = pneg %p1288_p11 }
  0x40   : > { %v396_v32 = vadd.f32 %v332_v24, %v1492_v2  ;;  %v397_v36 = vadd.f32 %v333_v26, %v1501_v6  ;;  %v398_v37 = vadd.f32 %v334_v27, %v1504_v7  ;;  %v337_v39 = vmul.f32 0.044715, %v273_v29  ;;  %s1292_s11 = scalar_lea.vmem %s1291_s5, 16384 }
  0x41   : > { %v399_v38 = vadd.f32 %v335_v28, %v1507_v8  ;;  %v458_v43 = vmul.f32 0.7978846, %v394_v30  ;;  %v459_v44 = vmul.f32 0.7978846, %v395_v31  ;;  %v400_v46 = vadd.f32 %v336_v33, %v1516_v12  ;;  %p1294_p9 = scmp.lt.s32.totalorder %s1292_s11, %s1286_s4 }
  0x42   : > { %v460_v45 = vmul.f32 0.7978846, %v396_v32  ;;  %v461_v47 = vmul.f32 0.7978846, %v397_v36  ;;  %v462_v48 = vmul.f32 0.7978846, %v398_v37  ;;  %v401_v50 = vadd.f32 %v337_v39, %v1519_v13 }
  0x43   : > { %v463_v49 = vmul.f32 0.7978846, %v399_v38  ;;  %1128 = vtanh.f32 %v458_v43  ;;  %v464_v51 = vmul.f32 0.7978846, %v400_v46  ;;  %v210_v52 = vmul.f32 %v1537_v34, %v1537_v34  ;;  %p1295_p13 = por %p1294_p9, %p1293_p8 }
  0x44   : > { %v211_v53 = vmul.f32 %v1540_v35, %v1540_v35  ;;  %1130 = vtanh.f32 %v459_v44  ;;  %v465_v55 = vmul.f32 0.7978846, %v401_v50  ;;  %v212_v56 = vmul.f32 %v1546_v40, %v1546_v40 }
  0x45   : > { %v213_v57 = vmul.f32 %v1549_v41, %v1549_v41  ;;  %1132 = vtanh.f32 %v460_v45  ;;  %v274_v58 = vmul.f32 %v210_v52, %v1537_v34  ;;  %v214_v60 = vmul.f32 %v1552_v42, %v1552_v42  ;;  %p1296_p1 = pnand %p1295_p13, %p1289_p12 }
  0x46   : > { %v275_v59 = vmul.f32 %v211_v53, %v1540_v35  ;;  %1134 = vtanh.f32 %v461_v47  ;;  %v276_v61 = vmul.f32 %v212_v56, %v1546_v40  ;;  %v215_v63 = vmul.f32 %v1561_v54, %v1561_v54 }
  0x47   : > { %v277_v62 = vmul.f32 %v213_v57, %v1549_v41  ;;  %1136 = vtanh.f32 %v462_v48  ;;  %v338_v3 = vmul.f32 0.044715, %v274_v58  ;;  %v278_v5 = vmul.f32 %v214_v60, %v1552_v42 }
  0x48   : > { %v339_v4 = vmul.f32 0.044715, %v275_v59  ;;  %1138 = vtanh.f32 %v463_v49  ;;  %v340_v9 = vmul.f32 0.044715, %v276_v61  ;;  %v279_v11 = vmul.f32 %v215_v63, %v1561_v54 }
  0x49   : > { %v341_v10 = vmul.f32 0.044715, %v277_v62  ;;  %1140 = vtanh.f32 %v464_v51  ;;  %v402_v15 = vadd.f32 %v338_v3, %v1537_v34  ;;  %v342_v17 = vmul.f32 0.044715, %v278_v5 }
  0x4a   : > { %v403_v16 = vadd.f32 %v339_v4, %v1540_v35  ;;  %1142 = vtanh.f32 %v465_v55  ;;  %v404_v19 = vadd.f32 %v340_v9, %v1546_v40  ;;  %v343_v21 = vmul.f32 0.044715, %v279_v11 }
  0x4b   : > { %v405_v20 = vadd.f32 %v341_v10, %v1549_v41  ;;  %v466_v23 = vmul.f32 0.7978846, %v402_v15  ;;  %v406_v25 = vadd.f32 %v342_v17, %v1552_v42  ;;  %v216_v26 = vmul.f32 %v1578_v14, %v1578_v14 }
  0x4c   : > { %v467_v24 = vmul.f32 0.7978846, %v403_v16  ;;  %v468_v27 = vmul.f32 0.7978846, %v404_v19  ;;  %v407_v29 = vadd.f32 %v343_v21, %v1561_v54  ;;  %v217_v30 = vmul.f32 %v1583_v18, %v1583_v18 }
  0x4d   : > { %v469_v28 = vmul.f32 0.7978846, %v405_v20  ;;  %v1129_v31 = vpop.eup %1128  ;;  %1144 = vtanh.f32 %v466_v23  ;;  %v470_v32 = vmul.f32 0.7978846, %v406_v25  ;;  %v280_v33 = vmul.f32 %v216_v26, %v1578_v14 }
  0x4e   : > { %v218_v36 = vmul.f32 %v1588_v22, %v1588_v22  ;;  %v1131_v37 = vpop.eup %1130  ;;  %v586_v38 = vadd.f32 1.0, %v1129_v31  ;;  %1146 = vtanh.f32 %v467_v24  ;;  %v471_v39 = vmul.f32 0.7978846, %v407_v29 }
  0x4f   : > { %v281_v43 = vmul.f32 %v217_v30, %v1583_v18  ;;  %v1133_v44 = vpop.eup %1132  ;;  %v587_v45 = vadd.f32 1.0, %v1131_v37  ;;  %1148 = vtanh.f32 %v468_v27  ;;  %v344_v46 = vmul.f32 0.044715, %v280_v33 }
  0x50   : > { %v1601_v47 = vmul.f32 %v218_v36, %v1588_v22  ;;  %v1135_v48 = vpop.eup %1134  ;;  %v650_v49 = vmul.f32 0.5, %v586_v38  ;;  %v588_v50 = vadd.f32 1.0, %v1133_v44  ;;  %1150 = vtanh.f32 %v469_v28 }
  0x51   : > { %v1603_v51 = vmul.f32 0.044715, %v281_v43  ;;  %v1137_v52 = vpop.eup %1136  ;;  %v651_v53 = vmul.f32 0.5, %v587_v45  ;;  %v589_v55 = vadd.f32 1.0, %v1135_v48  ;;  %1152 = vtanh.f32 %v470_v32 }
  0x52   : > { %v408_v56 = vadd.f32 %v344_v46, %v1578_v14  ;;  %v1139_v57 = vpop.eup %1138  ;;  %v714_v58 = vmul.f32 %v650_v49, %v1486_v0  ;;  %v652_v59 = vmul.f32 0.5, %v588_v50  ;;  %v590_v60 = vadd.f32 1.0, %v1137_v52 }
  0x53   : > { %1154 = vtanh.f32 %v471_v39  ;;  %v1141_v61 = vpop.eup %1140  ;;  %v715_v62 = vmul.f32 %v651_v53, %v1489_v1  ;;  %v653_v63 = vmul.f32 0.5, %v589_v55  ;;  %v591_v3 = vadd.f32 1.0, %v1139_v57 }
  0x54   : > { %v472_v4 = vmul.f32 0.7978846, %v408_v56  ;;  %v1143_v5 = vpop.eup %1142  ;;  %v778_v9 = vmul.f32 2.0, %v714_v58  ;;  %v716_v10 = vmul.f32 %v652_v59, %v1492_v2  ;;  %v654_v11 = vmul.f32 0.5, %v590_v60 }
  0x55   : > { %v592_v15 = vadd.f32 1.0, %v1141_v61  ;;  %v779_v16 = vmul.f32 2.0, %v715_v62  ;;  %v717_v17 = vmul.f32 %v653_v63, %v1501_v6  ;;  %v655_v0 = vmul.f32 0.5, %v591_v3 }
  0x56   : > { %v593_v19 = vadd.f32 1.0, %v1143_v5  ;;  %v842_v20 = vadd.f32 1.0, %v778_v9  ;;  %v780_v21 = vmul.f32 2.0, %v716_v10  ;;  %v718_v23 = vmul.f32 %v654_v11, %v1504_v7  ;;  %v1638_v11 = vld [vmem:[%s1479_s30 + $0x90] sm:$0xff] }
  0x57   : > { %v656_v1 = vmul.f32 0.5, %v592_v15  ;;  %v1145_v24 = vpop.eup %1144  ;;  %v843_v25 = vadd.f32 1.0, %v779_v16  ;;  %v781_v26 = vmul.f32 2.0, %v717_v17  ;;  %v719_v27 = vmul.f32 %v655_v0, %v1507_v8  ;;  %v1642_v17 = vld [vmem:[%s1479_s30 + $0x98] sm:$0xff] }
  0x58   : > { %v657_v28 = vmul.f32 0.5, %v593_v19  ;;  %v1147_v2 = vpop.eup %1146  ;;  %906 = vst [vmem:[%s1614_s17] sm:$0xff] %v842_v20  ;;  %v844_v6 = vadd.f32 1.0, %v780_v21  ;;  %v782_v29 = vmul.f32 2.0, %v718_v23  ;;  %v594_v30 = vadd.f32 1.0, %v1145_v24  ;;  %v1652_v21 = vld [vmem:[%s1479_s30 + $0xa8] sm:$0xff]  ;;  %v1658_v24 = vld [vmem:[%s1479_s30 + $0xb0] sm:$0xff] }
  0x59   : > { %v720_v7 = vmul.f32 %v656_v1, %v1516_v12  ;;  %v1149_v31 = vpop.eup %1148  ;;  %907 = vst [vmem:[%s1614_s17 + $0x8] sm:$0xff] %v843_v25  ;;  %v845_v32 = vadd.f32 1.0, %v781_v26  ;;  %v783_v33 = vmul.f32 2.0, %v719_v27  ;;  %v595_v36 = vadd.f32 1.0, %v1147_v2  ;;  %v1665_v2 = vld [vmem:[%s1479_s30 + $0xb8] sm:$0xff] }
  0x5a   : > { %v721_v8 = vmul.f32 %v657_v28, %v1519_v13  ;;  %v1151_v37 = vpop.eup %1150  ;;  %908 = vst [vmem:[%s1614_s17 + $0x10] sm:$0xff] %v844_v6  ;;  %v846_v38 = vadd.f32 1.0, %v782_v29  ;;  %v658_v43 = vmul.f32 0.5, %v594_v30  ;;  %v596_v44 = vadd.f32 1.0, %v1149_v31  ;;  %v1674_v31 = vld [vmem:[%s1479_s30 + $0xc0] sm:$0xff] }
  0x5b   : > { %v784_v39 = vmul.f32 2.0, %v720_v7  ;;  %v1153_v45 = vpop.eup %1152  ;;  %909 = vst [vmem:[%s1614_s17 + $0x18] sm:$0xff] %v845_v32  ;;  %v847_v12 = vadd.f32 1.0, %v783_v33  ;;  %v659_v48 = vmul.f32 0.5, %v595_v36  ;;  %v597_v49 = vadd.f32 1.0, %v1151_v37 }
  0x5c   : > { %v785_v46 = vmul.f32 2.0, %v721_v8  ;;  %910 = vst [vmem:[%s1614_s17 + $0x20] sm:$0xff] %v846_v38  ;;  %v722_v13 = vmul.f32 %v658_v43, %v1537_v34  ;;  %v660_v53 = vmul.f32 0.5, %v596_v44  ;;  %v598_v55 = vadd.f32 1.0, %v1153_v45 }
  0x5d   : > { %v1155_v50 = vpop.eup %1154  ;;  %v848_v52 = vadd.f32 1.0, %v784_v39  ;;  %911 = vst [vmem:[%s1614_s17 + $0x28] sm:$0xff] %v847_v12  ;;  %v723_v57 = vmul.f32 %v659_v48, %v1540_v35  ;;  %v661_v58 = vmul.f32 0.5, %v597_v49  ;;  %1156 = vtanh.f32 %v472_v4  ;;  %v1633_v35 = vld [vmem:[%s1479_s30 + $0x88] sm:$0xff] }
  0x5e   : > { %v849_v56 = vadd.f32 1.0, %v785_v46  ;;  %v599_v59 = vadd.f32 1.0, %v1155_v50  ;;  %v786_v60 = vmul.f32 2.0, %v722_v13  ;;  %v724_v61 = vmul.f32 %v660_v53, %v1546_v40 }
  0x5f   : > { %912 = vst [vmem:[%s1614_s17 + $0x30] sm:$0xff] %v848_v52  ;;  %v662_v62 = vmul.f32 0.5, %v598_v55  ;;  %v787_v34 = vmul.f32 2.0, %v723_v57  ;;  %v725_v63 = vmul.f32 %v661_v58, %v1549_v41  ;;  %v409_v5 = vadd.f32 %v1603_v51, %v1583_v18 }
  0x60   : > { %913 = vst [vmem:[%s1614_s17 + $0x38] sm:$0xff] %v849_v56  ;;  %v663_v3 = vmul.f32 0.5, %v599_v59  ;;  %v850_v9 = vadd.f32 1.0, %v786_v60  ;;  %v788_v10 = vmul.f32 2.0, %v724_v61  ;;  %v346_v4 = vmul.f32 0.044715, %v1601_v47 }
  0x61   : > { %v726_v40 = vmul.f32 %v662_v62, %v1552_v42  ;;  %v851_v15 = vadd.f32 1.0, %v787_v34  ;;  %v789_v16 = vmul.f32 2.0, %v725_v63  ;;  %v473_v51 = vmul.f32 0.7978846, %v409_v5  ;;  %v1649_v47 = vld [vmem:[%s1479_s30 + $0xa0] sm:$0xff]  ;;  %v1696_v63 = vld [vmem:[%s1479_s30 + $0xc8] sm:$0xff] }
  0x62   : > { %v727_v41 = vmul.f32 %v663_v3, %v1561_v54  ;;  %914 = vst [vmem:[%s1614_s17 + $0x40] sm:$0xff] %v850_v9  ;;  %v852_v0 = vadd.f32 1.0, %v788_v10  ;;  %v410_v20 = vadd.f32 %v346_v4, %v1588_v22  ;;  %v219_v42 = vmul.f32 %v1633_v35, %v1633_v35 }
  0x63   : > { %v790_v19 = vmul.f32 2.0, %v726_v40  ;;  %915 = vst [vmem:[%s1614_s17 + $0x48] sm:$0xff] %v851_v15  ;;  %v853_v54 = vadd.f32 1.0, %v789_v16  ;;  %1158 = vtanh.f32 %v473_v51  ;;  %v220_v1 = vmul.f32 %v1638_v11, %v1638_v11  ;;  %v1700_v40 = vld [vmem:[%s1479_s30 + $0xd0] sm:$0xff] }
  0x64   : > { %v791_v23 = vmul.f32 2.0, %v727_v41  ;;  %916 = vst [vmem:[%s1614_s17 + $0x50] sm:$0xff] %v852_v0  ;;  %v474_v26 = vmul.f32 0.7978846, %v410_v20  ;;  %v283_v27 = vmul.f32 %v219_v42, %v1633_v35  ;;  %v221_v28 = vmul.f32 %v1642_v17, %v1642_v17 }
  0x65   : > { %v854_v25 = vadd.f32 1.0, %v790_v19  ;;  %917 = vst [vmem:[%s1614_s17 + $0x58] sm:$0xff] %v853_v54  ;;  %v284_v29 = vmul.f32 %v220_v1, %v1638_v11  ;;  %v222_v7 = vmul.f32 %v1649_v47, %v1649_v47  ;;  %v223_v30 = vmul.f32 %v1652_v21, %v1652_v21  ;;  %v1709_v54 = vld [vmem:[%s1479_s30 + $0xd8] sm:$0xff] }
  0x66   : > { %v855_v6 = vadd.f32 1.0, %v791_v23  ;;  %1160 = vtanh.f32 %v474_v26  ;;  %v347_v32 = vmul.f32 0.044715, %v283_v27  ;;  %v285_v33 = vmul.f32 %v221_v28, %v1642_v17  ;;  %v1712_v23 = vld [vmem:[%s1479_s30 + $0xe0] sm:$0xff]  ;;  %v1715_v27 = vld [vmem:[%s1479_s30 + $0xe8] sm:$0xff] }
  0x67   : > { %918 = vst [vmem:[%s1614_s17 + $0x60] sm:$0xff] %v854_v25  ;;  %v224_v8 = vmul.f32 %v1658_v24, %v1658_v24  ;;  %v348_v36 = vmul.f32 0.044715, %v284_v29  ;;  %v286_v37 = vmul.f32 %v222_v7, %v1649_v47  ;;  %v287_v38 = vmul.f32 %v223_v30, %v1652_v21  ;;  %v1157_v43 = vpop.eup %1156 }
  0x68   : > { %919 = vst [vmem:[%s1614_s17 + $0x68] sm:$0xff] %v855_v6  ;;  %v225_v39 = vmul.f32 %v1665_v2, %v1665_v2  ;;  %v411_v44 = vadd.f32 %v347_v32, %v1633_v35  ;;  %v349_v45 = vmul.f32 0.044715, %v285_v33  ;;  %v226_v46 = vmul.f32 %v1674_v31, %v1674_v31 }
  0x69   : > { %v288_v12 = vmul.f32 %v224_v8, %v1658_v24  ;;  %v600_v48 = vadd.f32 1.0, %v1157_v43  ;;  %v412_v49 = vadd.f32 %v348_v36, %v1638_v11  ;;  %v350_v50 = vmul.f32 0.044715, %v286_v37 }
  0x6a   : > { %v351_v52 = vmul.f32 0.044715, %v287_v38  ;;  %v475_v13 = vmul.f32 0.7978846, %v411_v44  ;;  %v413_v53 = vadd.f32 %v349_v45, %v1642_v17  ;;  %v289_v56 = vmul.f32 %v225_v39, %v1665_v2  ;;  %v1732_v45 = vld [vmem:[%s1479_s30 + $0xf0] sm:$0xff] }
  0x6b   : > { %v352_v55 = vmul.f32 0.044715, %v288_v12  ;;  %v664_v57 = vmul.f32 0.5, %v600_v48  ;;  %v476_v58 = vmul.f32 0.7978846, %v412_v49  ;;  %v414_v59 = vadd.f32 %v350_v50, %v1649_v47 }
  0x6c   : > { %v415_v60 = vadd.f32 %v351_v52, %v1652_v21  ;;  %1162 = vtanh.f32 %v475_v13  ;;  %v477_v61 = vmul.f32 0.7978846, %v413_v53  ;;  %v353_v34 = vmul.f32 0.044715, %v289_v56 }
  0x6d   : > { %v416_v62 = vadd.f32 %v352_v55, %v1658_v24  ;;  %v1159_v3 = vpop.eup %1158  ;;  %v728_v5 = vmul.f32 %v664_v57, %v1578_v14  ;;  %1164 = vtanh.f32 %v476_v58  ;;  %v478_v9 = vmul.f32 0.7978846, %v414_v59 }
  0x6e   : > { %v479_v10 = vmul.f32 0.7978846, %v415_v60  ;;  %v601_v4 = vadd.f32 1.0, %v1159_v3  ;;  %1166 = vtanh.f32 %v477_v61  ;;  %v417_v16 = vadd.f32 %v353_v34, %v1665_v2 }
  0x6f   : > { %v480_v15 = vmul.f32 0.7978846, %v416_v62  ;;  %v792_v41 = vmul.f32 2.0, %v728_v5  ;;  %1168 = vtanh.f32 %v478_v9  ;;  %v290_v51 = vmul.f32 %v226_v46, %v1674_v31 }
  0x70   : > { %v227_v14 = vmul.f32 %v1696_v63, %v1696_v63  ;;  %v1161_v0 = vpop.eup %1160  ;;  %v665_v19 = vmul.f32 0.5, %v601_v4  ;;  %1170 = vtanh.f32 %v479_v10  ;;  %v481_v20 = vmul.f32 0.7978846, %v417_v16 }
  0x71   : > { %v228_v42 = vmul.f32 %v1700_v40, %v1700_v40  ;;  %v856_v1 = vadd.f32 1.0, %v792_v41  ;;  %v602_v25 = vadd.f32 1.0, %v1161_v0  ;;  %1172 = vtanh.f32 %v480_v15 }
  0x72   : > { %v354_v26 = vmul.f32 0.044715, %v290_v51  ;;  %v729_v28 = vmul.f32 %v665_v19, %v1583_v18  ;;  %1174 = vtanh.f32 %v481_v20  ;;  %v291_v6 = vmul.f32 %v227_v14, %v1696_v63 }
  0x73   : > { %v292_v29 = vmul.f32 %v228_v42, %v1700_v40  ;;  %920 = vst [vmem:[%s1614_s17 + $0x70] sm:$0xff] %v856_v1  ;;  %v666_v7 = vmul.f32 0.5, %v602_v25  ;;  %v229_v32 = vmul.f32 %v1709_v54, %v1709_v54  ;;  %v230_v33 = vmul.f32 %v1712_v23, %v1712_v23 }
  0x74   : > { %v418_v30 = vadd.f32 %v354_v26, %v1674_v31  ;;  %v793_v8 = vmul.f32 2.0, %v729_v28  ;;  %v355_v36 = vmul.f32 0.044715, %v291_v6  ;;  %v231_v18 = vmul.f32 %v1715_v27, %v1715_v27 }
  0x75   : > { %v356_v37 = vmul.f32 0.044715, %v292_v29  ;;  %v730_v38 = vmul.f32 %v666_v7, %v1588_v22  ;;  %v293_v43 = vmul.f32 %v229_v32, %v1709_v54  ;;  %v294_v44 = vmul.f32 %v230_v33, %v1712_v23 }
  0x76   : > { %v482_v39 = vmul.f32 0.7978846, %v418_v30  ;;  %v1163_v12 = vpop.eup %1162  ;;  %v857_v46 = vadd.f32 1.0, %v793_v8  ;;  %v419_v48 = vadd.f32 %v355_v36, %v1696_v63  ;;  %v295_v50 = vmul.f32 %v231_v18, %v1715_v27 }
  0x77   : > { %v420_v49 = vadd.f32 %v356_v37, %v1700_v40  ;;  %v1165_v52 = vpop.eup %1164  ;;  %v794_v13 = vmul.f32 2.0, %v730_v38  ;;  %v603_v53 = vadd.f32 1.0, %v1163_v12  ;;  %v357_v22 = vmul.f32 0.044715, %v293_v43  ;;  %v1752_v43 = vld [vmem:[%s1479_s30 + $0xf8] sm:$0xff] }
  0x78   : > { %1176 = vtanh.f32 %v482_v39  ;;  %v1167_v55 = vpop.eup %1166  ;;  %921 = vst [vmem:[%s1614_s17 + $0x78] sm:$0xff] %v857_v46  ;;  %v604_v56 = vadd.f32 1.0, %v1165_v52  ;;  %v483_v57 = vmul.f32 0.7978846, %v419_v48  ;;  %v232_v59 = vmul.f32 %v1732_v45, %v1732_v45 }
  0x79   : > { %v484_v58 = vmul.f32 0.7978846, %v420_v49  ;;  %v1169_v60 = vpop.eup %1168  ;;  %v858_v61 = vadd.f32 1.0, %v794_v13  ;;  %v667_v62 = vmul.f32 0.5, %v603_v53  ;;  %v605_v34 = vadd.f32 1.0, %v1167_v55  ;;  %v1759_v13 = vld [vmem:[%s1479_s30 + $0x100] sm:$0xff] }
  0x7a   : > { %v421_v3 = vadd.f32 %v357_v22, %v1709_v54  ;;  %v1171_v5 = vpop.eup %1170  ;;  %v668_v9 = vmul.f32 0.5, %v604_v56  ;;  %v606_v10 = vadd.f32 1.0, %v1169_v60  ;;  %1178 = vtanh.f32 %v483_v57  ;;  %v1765_v55 = vld [vmem:[%s1479_s30 + $0x108] sm:$0xff] }
  0x7b   : > { %v358_v4 = vmul.f32 0.044715, %v294_v44  ;;  %v1173_v15 = vpop.eup %1172  ;;  %922 = vst [vmem:[%s1614_s17 + $0x80] sm:$0xff] %v858_v61  ;;  %v731_v16 = vmul.f32 %v667_v62, %v1633_v35  ;;  %v669_v41 = vmul.f32 0.5, %v605_v34  ;;  %v607_v51 = vadd.f32 1.0, %v1171_v5 }
  0x7c   : > { %1180 = vtanh.f32 %v484_v58  ;;  %v1175_v14 = vpop.eup %1174  ;;  %v732_v0 = vmul.f32 %v668_v9, %v1638_v11  ;;  %v670_v19 = vmul.f32 0.5, %v606_v10  ;;  %v608_v20 = vadd.f32 1.0, %v1173_v15 }
  0x7d   : > { %v485_v42 = vmul.f32 0.7978846, %v421_v3  ;;  %v795_v1 = vmul.f32 2.0, %v731_v16  ;;  %v733_v25 = vmul.f32 %v669_v41, %v1642_v17  ;;  %v671_v26 = vmul.f32 0.5, %v607_v51 }
  0x7e   : > { %v609_v28 = vadd.f32 1.0, %v1175_v14  ;;  %v796_v6 = vmul.f32 2.0, %v732_v0  ;;  %v734_v29 = vmul.f32 %v670_v19, %v1649_v47  ;;  %v672_v7 = vmul.f32 0.5, %v608_v20  ;;  %v1781_v20 = vld [vmem:[%s1479_s30 + $0x110] sm:$0xff] }
  0x7f   : > { %1182 = vtanh.f32 %v485_v42  ;;  %v859_v35 = vadd.f32 1.0, %v795_v1  ;;  %v797_v30 = vmul.f32 2.0, %v733_v25  ;;  %v735_v11 = vmul.f32 %v671_v26, %v1652_v21 }
  0x80   : > { %v673_v32 = vmul.f32 0.5, %v609_v28  ;;  %v860_v33 = vadd.f32 1.0, %v796_v6  ;;  %v798_v8 = vmul.f32 2.0, %v734_v29  ;;  %v736_v17 = vmul.f32 %v672_v7, %v1658_v24  ;;  %v1786_v28 = vld [vmem:[%s1479_s30 + $0x118] sm:$0xff] }
  0x81   : > { %v422_v36 = vadd.f32 %v358_v4, %v1712_v23  ;;  %923 = vst [vmem:[%s1614_s17 + $0x88] sm:$0xff] %v859_v35  ;;  %v861_v47 = vadd.f32 1.0, %v797_v30  ;;  %v799_v18 = vmul.f32 2.0, %v735_v11  ;;  %v359_v39 = vmul.f32 0.044715, %v295_v50 }
  0x82   : > { %v1177_v37 = vpop.eup %1176  ;;  %v737_v38 = vmul.f32 %v673_v32, %v1665_v2  ;;  %924 = vst [vmem:[%s1614_s17 + $0x90] sm:$0xff] %v860_v33  ;;  %v862_v21 = vadd.f32 1.0, %v798_v8  ;;  %v800_v44 = vmul.f32 2.0, %v736_v17  ;;  %v296_v52 = vmul.f32 %v232_v59, %v1732_v45  ;;  %v1797_v17 = vld [vmem:[%s1479_s30 + $0x120] sm:$0xff] }
  0x83   : > { %v610_v12 = vadd.f32 1.0, %v1177_v37  ;;  %v486_v24 = vmul.f32 0.7978846, %v422_v36  ;;  %925 = vst [vmem:[%s1614_s17 + $0x98] sm:$0xff] %v861_v47  ;;  %v863_v46 = vadd.f32 1.0, %v799_v18  ;;  %v423_v49 = vadd.f32 %v359_v39, %v1715_v27  ;;  %v1800_v36 = vld [vmem:[%s1479_s30 + $0x128] sm:$0xff] }
  0x84   : > { %v801_v48 = vmul.f32 2.0, %v737_v38  ;;  %v1179_v2 = vpop.eup %1178  ;;  %926 = vst [vmem:[%s1614_s17 + $0xa0] sm:$0xff] %v862_v21  ;;  %v864_v50 = vadd.f32 1.0, %v800_v44  ;;  %v233_v22 = vmul.f32 %v1752_v43, %v1752_v43  ;;  %v360_v61 = vmul.f32 0.044715, %v296_v52 }
  0x85   : > { %v674_v53 = vmul.f32 0.5, %v610_v12  ;;  %1184 = vtanh.f32 %v486_v24  ;;  %927 = vst [vmem:[%s1614_s17 + $0xa8] sm:$0xff] %v863_v46  ;;  %v611_v58 = vadd.f32 1.0, %v1179_v2  ;;  %v487_v60 = vmul.f32 0.7978846, %v423_v49  ;;  %v1814_v49 = vld [vmem:[%s1479_s30 + $0x138] sm:$0xff] }
  0x86   : > { %v1181_v56 = vpop.eup %1180  ;;  %v865_v57 = vadd.f32 1.0, %v801_v48  ;;  %928 = vst [vmem:[%s1614_s17 + $0xb0] sm:$0xff] %v864_v50  ;;  %v297_v34 = vmul.f32 %v233_v22, %v1752_v43  ;;  %v234_v3 = vmul.f32 %v1759_v13, %v1759_v13  ;;  %v424_v9 = vadd.f32 %v360_v61, %v1732_v45  ;;  %v1811_v48 = vld [vmem:[%s1479_s30 + $0x130] sm:$0xff]  ;;  %v1817_v22 = vld [vmem:[%s1479_s30 + $0x140] sm:$0xff] }
  0x87   : > { %v738_v59 = vmul.f32 %v674_v53, %v1674_v31  ;;  %v612_v62 = vadd.f32 1.0, %v1181_v56  ;;  %v675_v5 = vmul.f32 0.5, %v611_v58  ;;  %1186 = vtanh.f32 %v487_v60 }
  0x88   : > { %929 = vst [vmem:[%s1614_s17 + $0xb8] sm:$0xff] %v865_v57  ;;  %v235_v10 = vmul.f32 %v1765_v55, %v1765_v55  ;;  %v361_v31 = vmul.f32 0.044715, %v297_v34  ;;  %v298_v41 = vmul.f32 %v234_v3, %v1759_v13  ;;  %v488_v0 = vmul.f32 0.7978846, %v424_v9 }
  0x89   : > { %v1183_v4 = vpop.eup %1182  ;;  %v802_v15 = vmul.f32 2.0, %v738_v59  ;;  %v676_v16 = vmul.f32 0.5, %v612_v62  ;;  %v739_v51 = vmul.f32 %v675_v5, %v1696_v63  ;;  %v237_v8 = vmul.f32 %v1786_v28, %v1786_v28 }
  0x8a   : > { %v613_v14 = vadd.f32 1.0, %v1183_v4  ;;  %v299_v19 = vmul.f32 %v235_v10, %v1765_v55  ;;  %v425_v25 = vadd.f32 %v361_v31, %v1752_v43  ;;  %v362_v26 = vmul.f32 0.044715, %v298_v41 }
  0x8b   : > { %v866_v42 = vadd.f32 1.0, %v802_v15  ;;  %v740_v1 = vmul.f32 %v676_v16, %v1700_v40  ;;  %v803_v6 = vmul.f32 2.0, %v739_v51  ;;  %1188 = vtanh.f32 %v488_v0 }
  0x8c   : > { %v677_v29 = vmul.f32 0.5, %v613_v14  ;;  %v363_v63 = vmul.f32 0.044715, %v299_v19  ;;  %v489_v35 = vmul.f32 0.7978846, %v425_v25  ;;  %v426_v30 = vadd.f32 %v362_v26, %v1759_v13 }
  0x8d   : > { %930 = vst [vmem:[%s1614_s17 + $0xc0] sm:$0xff] %v866_v42  ;;  %v804_v7 = vmul.f32 2.0, %v740_v1  ;;  %v236_v40 = vmul.f32 %v1781_v20, %v1781_v20  ;;  %v867_v11 = vadd.f32 1.0, %v803_v6  ;;  %v301_v44 = vmul.f32 %v237_v8, %v1786_v28 }
  0x8e   : > { %v741_v32 = vmul.f32 %v677_v29, %v1709_v54  ;;  %v427_v33 = vadd.f32 %v363_v63, %v1765_v55  ;;  %1190 = vtanh.f32 %v489_v35  ;;  %v490_v18 = vmul.f32 0.7978846, %v426_v30 }
  0x8f   : > { %v1185_v37 = vpop.eup %1184  ;;  %v868_v47 = vadd.f32 1.0, %v804_v7  ;;  %v300_v38 = vmul.f32 %v236_v40, %v1781_v20  ;;  %931 = vst [vmem:[%s1614_s17 + $0xc8] sm:$0xff] %v867_v11  ;;  %v238_v24 = vmul.f32 %v1797_v17, %v1797_v17  ;;  %v239_v46 = vmul.f32 %v1800_v36, %v1800_v36 }
  0x90   : > { %v805_v39 = vmul.f32 2.0, %v741_v32  ;;  %v614_v54 = vadd.f32 1.0, %v1185_v37  ;;  %v491_v21 = vmul.f32 0.7978846, %v427_v33  ;;  %1192 = vtanh.f32 %v490_v18  ;;  %v1841_v33 = vld [vmem:[%s1479_s30 + $0x148] sm:$0xff] }
  0x91   : > { %932 = vst [vmem:[%s1614_s17 + $0xd0] sm:$0xff] %v868_v47  ;;  %v364_v12 = vmul.f32 0.044715, %v300_v38  ;;  %v1187_v52 = vpop.eup %1186  ;;  %v365_v53 = vmul.f32 0.044715, %v301_v44  ;;  %v302_v58 = vmul.f32 %v238_v24, %v1797_v17  ;;  %v303_v60 = vmul.f32 %v239_v46, %v1800_v36  ;;  %v1846_v44 = vld [vmem:[%s1479_s30 + $0x150] sm:$0xff] }
  0x92   : > { %v869_v2 = vadd.f32 1.0, %v805_v39  ;;  %v678_v50 = vmul.f32 0.5, %v614_v54  ;;  %1194 = vtanh.f32 %v491_v21  ;;  %v615_v56 = vadd.f32 1.0, %v1187_v52  ;;  %v1852_v46 = vld [vmem:[%s1479_s30 + $0x158] sm:$0xff] }
  0x93   : > { %v428_v57 = vadd.f32 %v364_v12, %v1781_v20  ;;  %v429_v59 = vadd.f32 %v365_v53, %v1786_v28  ;;  %v240_v62 = vmul.f32 %v1811_v48, %v1811_v48  ;;  %v241_v34 = vmul.f32 %v1814_v49, %v1814_v49 }
  0x94   : > { %933 = vst [vmem:[%s1614_s17 + $0xd8] sm:$0xff] %v869_v2  ;;  %v742_v61 = vmul.f32 %v678_v50, %v1712_v23  ;;  %v679_v3 = vmul.f32 0.5, %v615_v56  ;;  %v366_v9 = vmul.f32 0.044715, %v302_v58  ;;  %v242_v10 = vmul.f32 %v1817_v22, %v1817_v22 }
  0x95   : > { %v492_v5 = vmul.f32 0.7978846, %v428_v57  ;;  %v1189_v4 = vpop.eup %1188  ;;  %v493_v16 = vmul.f32 0.7978846, %v429_v59  ;;  %v367_v31 = vmul.f32 0.044715, %v303_v60  ;;  %v304_v23 = vmul.f32 %v240_v62, %v1811_v48 }
  0x96   : > { %v806_v15 = vmul.f32 2.0, %v742_v61  ;;  %v743_v41 = vmul.f32 %v679_v3, %v1715_v27  ;;  %v616_v51 = vadd.f32 1.0, %v1189_v4  ;;  %v430_v14 = vadd.f32 %v366_v9, %v1797_v17 }
  0x97   : > { %1196 = vtanh.f32 %v492_v5  ;;  %v431_v19 = vadd.f32 %v367_v31, %v1800_v36  ;;  %v368_v42 = vmul.f32 0.044715, %v304_v23  ;;  %v305_v29 = vmul.f32 %v241_v34, %v1814_v49 }
  0x98   : > { %v870_v0 = vadd.f32 1.0, %v806_v15  ;;  %1198 = vtanh.f32 %v493_v16  ;;  %v1191_v1 = vpop.eup %1190  ;;  %v807_v25 = vmul.f32 2.0, %v743_v41  ;;  %v680_v26 = vmul.f32 0.5, %v616_v51 }
  0x99   : > { %v494_v6 = vmul.f32 0.7978846, %v430_v14  ;;  %v617_v63 = vadd.f32 1.0, %v1191_v1  ;;  %v495_v27 = vmul.f32 0.7978846, %v431_v19  ;;  %v432_v7 = vadd.f32 %v368_v42, %v1811_v48 }
  0x9a   : > { %934 = vst [vmem:[%s1614_s17 + $0xe0] sm:$0xff] %v870_v0  ;;  %v306_v35 = vmul.f32 %v242_v10, %v1817_v22  ;;  %v1193_v30 = vpop.eup %1192  ;;  %v871_v40 = vadd.f32 1.0, %v807_v25  ;;  %v744_v11 = vmul.f32 %v680_v26, %v1732_v45  ;;  %v369_v32 = vmul.f32 0.044715, %v305_v29  ;;  %v1864_v10 = vld [vmem:[%s1479_s30 + $0x160] sm:$0xff] }
  0x9b   : > { %1200 = vtanh.f32 %v494_v6  ;;  %v681_v37 = vmul.f32 0.5, %v617_v63  ;;  %v618_v47 = vadd.f32 1.0, %v1193_v30  ;;  %v496_v18 = vmul.f32 0.7978846, %v432_v7 }
  0x9c   : > { %v1195_v8 = vpop.eup %1194  ;;  %1202 = vtanh.f32 %v495_v27  ;;  %935 = vst [vmem:[%s1614_s17 + $0xe8] sm:$0xff] %v871_v40  ;;  %v808_v38 = vmul.f32 2.0, %v744_v11  ;;  %v433_v54 = vadd.f32 %v369_v32, %v1814_v49  ;;  %v370_v21 = vmul.f32 0.044715, %v306_v35 }
  0x9d   : > { %v619_v39 = vadd.f32 1.0, %v1195_v8  ;;  %v745_v45 = vmul.f32 %v681_v37, %v1752_v43  ;;  %v682_v12 = vmul.f32 0.5, %v618_v47  ;;  %1204 = vtanh.f32 %v496_v18  ;;  %v1880_v18 = vld [vmem:[%s1479_s30 + $0x168] sm:$0xff] }
  0x9e   : > { %v243_v24 = vmul.f32 %v1841_v33, %v1841_v33  ;;  %v872_v52 = vadd.f32 1.0, %v808_v38  ;;  %v497_v50 = vmul.f32 0.7978846, %v433_v54  ;;  %v434_v53 = vadd.f32 %v370_v21, %v1817_v22  ;;  %v1884_v21 = vld [vmem:[%s1479_s30 + $0x170] sm:$0xff] }
  0x9f   : > { %v683_v2 = vmul.f32 0.5, %v619_v39  ;;  %v809_v56 = vmul.f32 2.0, %v745_v45  ;;  %v746_v57 = vmul.f32 %v682_v12, %v1759_v13  ;;  %v244_v43 = vmul.f32 %v1846_v44, %v1846_v44 }
  0xa0   : > { %v307_v58 = vmul.f32 %v243_v24, %v1841_v33  ;;  %936 = vst [vmem:[%s1614_s17 + $0xf0] sm:$0xff] %v872_v52  ;;  %1206 = vtanh.f32 %v497_v50  ;;  %v498_v59 = vmul.f32 0.7978846, %v434_v53  ;;  %v245_v62 = vmul.f32 %v1852_v46, %v1852_v46 }
  0xa1   : > { %v1197_v60 = vpop.eup %1196  ;;  %v747_v61 = vmul.f32 %v683_v2, %v1765_v55  ;;  %v873_v3 = vadd.f32 1.0, %v809_v56  ;;  %v810_v5 = vmul.f32 2.0, %v746_v57  ;;  %v308_v16 = vmul.f32 %v244_v43, %v1846_v44  ;;  %v1896_v43 = vld [vmem:[%s1479_s30 + $0x178] sm:$0xff] }
  0xa2   : > { %v1199_v34 = vpop.eup %1198  ;;  %v620_v9 = vadd.f32 1.0, %v1197_v60  ;;  %v371_v13 = vmul.f32 0.044715, %v307_v58  ;;  %1208 = vtanh.f32 %v498_v59  ;;  %v309_v41 = vmul.f32 %v245_v62, %v1852_v46 }
  0xa3   : > { %v811_v4 = vmul.f32 2.0, %v747_v61  ;;  %v621_v15 = vadd.f32 1.0, %v1199_v34  ;;  %937 = vst [vmem:[%s1614_s17 + $0xf8] sm:$0xff] %v873_v3  ;;  %v874_v55 = vadd.f32 1.0, %v810_v5  ;;  %v372_v19 = vmul.f32 0.044715, %v308_v16 }
  0xa4   : > { %v684_v31 = vmul.f32 0.5, %v620_v9  ;;  %v435_v23 = vadd.f32 %v371_v13, %v1841_v33  ;;  %v246_v42 = vmul.f32 %v1864_v10, %v1864_v10  ;;  %v373_v29 = vmul.f32 0.044715, %v309_v41  ;;  %v1899_v34 = vld [vmem:[%s1479_s30 + $0x180] sm:$0xff]  ;;  %v1904_v13 = vld [vmem:[%s1479_s30 + $0x188] sm:$0xff] }
  0xa5   : > { %v1201_v51 = vpop.eup %1200  ;;  %v875_v14 = vadd.f32 1.0, %v811_v4  ;;  %v685_v0 = vmul.f32 0.5, %v621_v15  ;;  %938 = vst [vmem:[%s1614_s17 + $0x100] sm:$0xff] %v874_v55  ;;  %v436_v7 = vadd.f32 %v372_v19, %v1846_v44  ;;  %v247_v58 = vmul.f32 %v1880_v18, %v1880_v18 }
  0xa6   : > { %v1203_v1 = vpop.eup %1202  ;;  %v748_v25 = vmul.f32 %v684_v31, %v1781_v20  ;;  %v622_v26 = vadd.f32 1.0, %v1201_v51  ;;  %v499_v6 = vmul.f32 0.7978846, %v435_v23  ;;  %v310_v35 = vmul.f32 %v246_v42, %v1864_v10  ;;  %v1918_v42 = vld [vmem:[%s1479_s30 + $0x190] sm:$0xff] }
  0xa7   : > { %939 = vst [vmem:[%s1614_s17 + $0x108] sm:$0xff] %v875_v14  ;;  %v749_v63 = vmul.f32 %v685_v0, %v1786_v28  ;;  %v623_v27 = vadd.f32 1.0, %v1203_v1  ;;  %v1205_v30 = vpop.eup %1204  ;;  %v437_v32 = vadd.f32 %v373_v29, %v1852_v46  ;;  %v500_v47 = vmul.f32 0.7978846, %v436_v7 }
  0xa8   : > { %v812_v40 = vmul.f32 2.0, %v748_v25  ;;  %v686_v11 = vmul.f32 0.5, %v622_v26  ;;  %1210 = vtanh.f32 %v499_v6  ;;  %v624_v37 = vadd.f32 1.0, %v1205_v30 }
  0xa9   : > { %v813_v20 = vmul.f32 2.0, %v749_v63  ;;  %v687_v8 = vmul.f32 0.5, %v623_v27  ;;  %v501_v39 = vmul.f32 0.7978846, %v437_v32  ;;  %v374_v54 = vmul.f32 0.044715, %v310_v35 }
  0xaa   : > { %v876_v28 = vadd.f32 1.0, %v812_v40  ;;  %v750_v38 = vmul.f32 %v686_v11, %v1797_v17  ;;  %v1207_v45 = vpop.eup %1206  ;;  %v688_v52 = vmul.f32 0.5, %v624_v37  ;;  %1212 = vtanh.f32 %v500_v47 }
  0xab   : > { %v877_v12 = vadd.f32 1.0, %v813_v20  ;;  %v751_v24 = vmul.f32 %v687_v8, %v1800_v36  ;;  %v625_v50 = vadd.f32 1.0, %v1207_v45  ;;  %1214 = vtanh.f32 %v501_v39 }
  0xac   : > { %940 = vst [vmem:[%s1614_s17 + $0x110] sm:$0xff] %v876_v28  ;;  %v814_v2 = vmul.f32 2.0, %v750_v38  ;;  %v438_v53 = vadd.f32 %v374_v54, %v1864_v10  ;;  %v1209_v56 = vpop.eup %1208  ;;  %v752_v57 = vmul.f32 %v688_v52, %v1811_v48  ;;  %v248_v36 = vmul.f32 %v1884_v21, %v1884_v21  ;;  %v1931_v54 = vld [vmem:[%s1479_s30 + $0x198] sm:$0xff] }
  0xad   : > { %941 = vst [vmem:[%s1614_s17 + $0x118] sm:$0xff] %v877_v12  ;;  %v815_v17 = vmul.f32 2.0, %v751_v24  ;;  %v689_v61 = vmul.f32 0.5, %v625_v50  ;;  %v626_v59 = vadd.f32 1.0, %v1209_v56  ;;  %v311_v9 = vmul.f32 %v247_v58, %v1880_v18  ;;  %v1941_v58 = vld [vmem:[%s1479_s30 + $0x1a0] sm:$0xff] }
  0xae   : > { %v878_v60 = vadd.f32 1.0, %v814_v2  ;;  %v502_v62 = vmul.f32 0.7978846, %v438_v53  ;;  %v816_v5 = vmul.f32 2.0, %v752_v57  ;;  %v312_v48 = vmul.f32 %v248_v36, %v1884_v21 }
  0xaf   : > { %v879_v3 = vadd.f32 1.0, %v815_v17  ;;  %v753_v4 = vmul.f32 %v689_v61, %v1814_v49  ;;  %v690_v15 = vmul.f32 0.5, %v626_v59  ;;  %v249_v16 = vmul.f32 %v1896_v43, %v1896_v43 }
  0xb0   : > { %942 = vst [vmem:[%s1614_s17 + $0x120] sm:$0xff] %v878_v60  ;;  %1216 = vtanh.f32 %v502_v62  ;;  %v880_v55 = vadd.f32 1.0, %v816_v5  ;;  %v375_v31 = vmul.f32 0.044715, %v311_v9  ;;  %v376_v23 = vmul.f32 0.044715, %v312_v48 }
  0xb1   : > { %943 = vst [vmem:[%s1614_s17 + $0x128] sm:$0xff] %v879_v3  ;;  %v250_v41 = vmul.f32 %v1899_v34, %v1899_v34  ;;  %v817_v14 = vmul.f32 2.0, %v753_v4  ;;  %v754_v0 = vmul.f32 %v690_v15, %v1817_v22  ;;  %v313_v19 = vmul.f32 %v249_v16, %v1896_v43  ;;  %v1945_v62 = vld [vmem:[%s1479_s30 + $0x1a8] sm:$0xff]  ;;  %v1949_v9 = vld [vmem:[%s1479_s30 + $0x1b0] sm:$0xff]  ;;  %v1955_v15 = vld [vmem:[%s1479_s30 + $0x1b8] sm:$0xff] }
  0xb2   : > { %v1211_v51 = vpop.eup %1210  ;;  %v251_v49 = vmul.f32 %v1904_v13, %v1904_v13  ;;  %944 = vst [vmem:[%s1614_s17 + $0x130] sm:$0xff] %v880_v55  ;;  %v439_v25 = vadd.f32 %v375_v31, %v1880_v18  ;;  %v440_v26 = vadd.f32 %v376_v23, %v1884_v21  ;;  %v252_v11 = vmul.f32 %v1918_v42, %v1918_v42 }
  0xb3   : > { %v627_v1 = vadd.f32 1.0, %v1211_v51  ;;  %v314_v6 = vmul.f32 %v250_v41, %v1899_v34  ;;  %v881_v29 = vadd.f32 1.0, %v817_v14  ;;  %v818_v63 = vmul.f32 2.0, %v754_v0  ;;  %v1961_v41 = vld [vmem:[%s1479_s30 + $0x1c0] sm:$0xff] }
  0xb4   : > { %v377_v27 = vmul.f32 0.044715, %v313_v19  ;;  %v315_v22 = vmul.f32 %v251_v49, %v1904_v13  ;;  %v1213_v7 = vpop.eup %1212  ;;  %v503_v30 = vmul.f32 0.7978846, %v439_v25  ;;  %v504_v40 = vmul.f32 0.7978846, %v440_v26 }
  0xb5   : > { %v691_v35 = vmul.f32 0.5, %v627_v1  ;;  %v1215_v32 = vpop.eup %1214  ;;  %945 = vst [vmem:[%s1614_s17 + $0x138] sm:$0xff] %v881_v29  ;;  %v882_v20 = vadd.f32 1.0, %v818_v63  ;;  %v628_v8 = vadd.f32 1.0, %v1213_v7  ;;  %v378_v47 = vmul.f32 0.044715, %v314_v6 }
  0xb6   : > { %v441_v37 = vadd.f32 %v377_v27, %v1896_v43  ;;  %v629_v38 = vadd.f32 1.0, %v1215_v32  ;;  %1218 = vtanh.f32 %v503_v30  ;;  %v379_v39 = vmul.f32 0.044715, %v315_v22 }
  0xb7   : > { %v755_v28 = vmul.f32 %v691_v35, %v1841_v33  ;;  %946 = vst [vmem:[%s1614_s17 + $0x140] sm:$0xff] %v882_v20  ;;  %v692_v45 = vmul.f32 0.5, %v628_v8  ;;  %1220 = vtanh.f32 %v504_v40  ;;  %v442_v24 = vadd.f32 %v378_v47, %v1899_v34 }
  0xb8   : > { %v505_v12 = vmul.f32 0.7978846, %v441_v37  ;;  %v693_v2 = vmul.f32 0.5, %v629_v38  ;;  %v443_v50 = vadd.f32 %v379_v39, %v1904_v13  ;;  %v316_v53 = vmul.f32 %v252_v11, %v1918_v42 }
  0xb9   : > { %v819_v52 = vmul.f32 2.0, %v755_v28  ;;  %v756_v56 = vmul.f32 %v692_v45, %v1846_v44  ;;  %v506_v17 = vmul.f32 0.7978846, %v442_v24  ;;  %v253_v57 = vmul.f32 %v1931_v54, %v1931_v54 }
  0xba   : > { %v1217_v33 = vpop.eup %1216  ;;  %1222 = vtanh.f32 %v505_v12  ;;  %v757_v60 = vmul.f32 %v693_v2, %v1852_v46  ;;  %v507_v59 = vmul.f32 0.7978846, %v443_v50  ;;  %v380_v5 = vmul.f32 0.044715, %v316_v53 }
  0xbb   : > { %v883_v36 = vadd.f32 1.0, %v819_v52  ;;  %v630_v61 = vadd.f32 1.0, %v1217_v33  ;;  %v820_v3 = vmul.f32 2.0, %v756_v56  ;;  %1224 = vtanh.f32 %v506_v17 }
  0xbc   : > { %v317_v44 = vmul.f32 %v253_v57, %v1931_v54  ;;  %v821_v48 = vmul.f32 2.0, %v757_v60  ;;  %1226 = vtanh.f32 %v507_v59  ;;  %v254_v46 = vmul.f32 %v1941_v58, %v1941_v58 }
  0xbd   : > { %947 = vst [vmem:[%s1614_s17 + $0x148] sm:$0xff] %v883_v36  ;;  %v694_v4 = vmul.f32 0.5, %v630_v61  ;;  %v884_v16 = vadd.f32 1.0, %v820_v3  ;;  %v444_v55 = vadd.f32 %v380_v5, %v1918_v42  ;;  %v255_v23 = vmul.f32 %v1945_v62, %v1945_v62 }
  0xbe   : > { %v381_v31 = vmul.f32 0.044715, %v317_v44  ;;  %v885_v51 = vadd.f32 1.0, %v821_v48  ;;  %v318_v0 = vmul.f32 %v254_v46, %v1941_v58  ;;  %v256_v19 = vmul.f32 %v1949_v9, %v1949_v9  ;;  %v1987_v44 = vld [vmem:[%s1479_s30 + $0x1c8] sm:$0xff]  ;;  %v1990_v48 = vld [vmem:[%s1479_s30 + $0x1d0] sm:$0xff] }
  0xbf   : > { %v758_v14 = vmul.f32 %v694_v4, %v1864_v10  ;;  %948 = vst [vmem:[%s1614_s17 + $0x150] sm:$0xff] %v884_v16  ;;  %v508_v49 = vmul.f32 0.7978846, %v444_v55  ;;  %v319_v25 = vmul.f32 %v255_v23, %v1945_v62  ;;  %v257_v26 = vmul.f32 %v1955_v15, %v1955_v15 }
  0xc0   : > { %v445_v1 = vadd.f32 %v381_v31, %v1931_v54  ;;  %v1219_v6 = vpop.eup %1218  ;;  %949 = vst [vmem:[%s1614_s17 + $0x158] sm:$0xff] %v885_v51  ;;  %v382_v63 = vmul.f32 0.044715, %v318_v0  ;;  %v320_v10 = vmul.f32 %v256_v19, %v1949_v9  ;;  %v258_v27 = vmul.f32 %v1961_v41, %v1961_v41 }
  0xc1   : > { %v822_v29 = vmul.f32 2.0, %v758_v14  ;;  %v1221_v22 = vpop.eup %1220  ;;  %v631_v7 = vadd.f32 1.0, %v1219_v6  ;;  %1228 = vtanh.f32 %v508_v49  ;;  %v383_v30 = vmul.f32 0.044715, %v319_v25  ;;  %v2001_v49 = vld [vmem:[%s1479_s30 + $0x1d8] sm:$0xff] }
  0xc2   : > { %v509_v35 = vmul.f32 0.7978846, %v445_v1  ;;  %v632_v11 = vadd.f32 1.0, %v1221_v22  ;;  %v446_v32 = vadd.f32 %v382_v63, %v1941_v58  ;;  %v384_v20 = vmul.f32 0.044715, %v320_v10  ;;  %v2007_v10 = vld [vmem:[%s1479_s30 + $0x1e0] sm:$0xff] }
  0xc3   : > { %v886_v40 = vadd.f32 1.0, %v822_v29  ;;  %v695_v37 = vmul.f32 0.5, %v631_v7  ;;  %v447_v47 = vadd.f32 %v383_v30, %v1945_v62  ;;  %v321_v28 = vmul.f32 %v257_v26, %v1955_v15  ;;  %v2013_v30 = vld [vmem:[%s1479_s30 + $0x1e8] sm:$0xff] }
  0xc4   : > { %v1223_v8 = vpop.eup %1222  ;;  %1230 = vtanh.f32 %v509_v35  ;;  %v696_v38 = vmul.f32 0.5, %v632_v11  ;;  %v510_v45 = vmul.f32 0.7978846, %v446_v32  ;;  %v448_v12 = vadd.f32 %v384_v20, %v1949_v9 }
  0xc5   : > { %950 = vst [vmem:[%s1614_s17 + $0x160] sm:$0xff] %v886_v40  ;;  %v633_v39 = vadd.f32 1.0, %v1223_v8  ;;  %v1225_v24 = vpop.eup %1224  ;;  %v759_v52 = vmul.f32 %v695_v37, %v1880_v18  ;;  %v511_v2 = vmul.f32 0.7978846, %v447_v47  ;;  %v385_v50 = vmul.f32 0.044715, %v321_v28 }
  0xc6   : > { %v322_v53 = vmul.f32 %v258_v27, %v1961_v41  ;;  %v1227_v33 = vpop.eup %1226  ;;  %v760_v56 = vmul.f32 %v696_v38, %v1884_v21  ;;  %v634_v57 = vadd.f32 1.0, %v1225_v24  ;;  %1232 = vtanh.f32 %v510_v45 }
  0xc7   : > { %v697_v17 = vmul.f32 0.5, %v633_v39  ;;  %v823_v36 = vmul.f32 2.0, %v759_v52  ;;  %v635_v60 = vadd.f32 1.0, %v1227_v33  ;;  %1234 = vtanh.f32 %v511_v2 }
  0xc8   : > { %v512_v61 = vmul.f32 0.7978846, %v448_v12  ;;  %v824_v59 = vmul.f32 2.0, %v760_v56  ;;  %v698_v3 = vmul.f32 0.5, %v634_v57  ;;  %v449_v5 = vadd.f32 %v385_v50, %v1955_v15 }
  0xc9   : > { %v761_v18 = vmul.f32 %v697_v17, %v1896_v43  ;;  %v887_v21 = vadd.f32 1.0, %v823_v36  ;;  %v699_v4 = vmul.f32 0.5, %v635_v60  ;;  %v386_v46 = vmul.f32 0.044715, %v322_v53 }
  0xca   : > { %1236 = vtanh.f32 %v512_v61  ;;  %v888_v16 = vadd.f32 1.0, %v824_v59  ;;  %v762_v31 = vmul.f32 %v698_v3, %v1899_v34  ;;  %v513_v23 = vmul.f32 0.7978846, %v449_v5  ;;  %v2030_v5 = vld [vmem:[%s1479_s30 + $0x1f0] sm:$0xff] }
  0xcb   : > { %v825_v55 = vmul.f32 2.0, %v761_v18  ;;  %v1229_v51 = vpop.eup %1228  ;;  %951 = vst [vmem:[%s1614_s17 + $0x168] sm:$0xff] %v887_v21  ;;  %v763_v43 = vmul.f32 %v699_v4, %v1904_v13  ;;  %v450_v14 = vadd.f32 %v386_v46, %v1961_v41  ;;  %v259_v0 = vmul.f32 %v1987_v44, %v1987_v44 }
  0xcc   : > { %v260_v19 = vmul.f32 %v1990_v48, %v1990_v48  ;;  %952 = vst [vmem:[%s1614_s17 + $0x170] sm:$0xff] %v888_v16  ;;  %v826_v1 = vmul.f32 2.0, %v762_v31  ;;  %v636_v25 = vadd.f32 1.0, %v1229_v51  ;;  %1238 = vtanh.f32 %v513_v23 }
  0xcd   : > { %v889_v34 = vadd.f32 1.0, %v825_v55  ;;  %v827_v6 = vmul.f32 2.0, %v763_v43  ;;  %v514_v13 = vmul.f32 0.7978846, %v450_v14  ;;  %v323_v29 = vmul.f32 %v259_v0, %v1987_v44 }
  0xce   : > { %v1231_v26 = vpop.eup %1230  ;;  %v324_v63 = vmul.f32 %v260_v19, %v1990_v48  ;;  %v890_v27 = vadd.f32 1.0, %v826_v1  ;;  %v700_v22 = vmul.f32 0.5, %v636_v25  ;;  %v261_v35 = vmul.f32 %v2001_v49, %v2001_v49  ;;  %v2041_v19 = vld [vmem:[%s1479_s30 + $0x1f8] sm:$0xff] }
  0xcf   : > { %953 = vst [vmem:[%s1614_s17 + $0x178] sm:$0xff] %v889_v34  ;;  %v637_v7 = vadd.f32 1.0, %v1231_v26  ;;  %v891_v40 = vadd.f32 1.0, %v827_v6  ;;  %1240 = vtanh.f32 %v514_v13  ;;  %v387_v11 = vmul.f32 0.044715, %v323_v29 }
  0xd0   : > { %v388_v32 = vmul.f32 0.044715, %v324_v63  ;;  %v1233_v20 = vpop.eup %1232  ;;  %954 = vst [vmem:[%s1614_s17 + $0x180] sm:$0xff] %v890_v27  ;;  %v764_v8 = vmul.f32 %v700_v22, %v1918_v42  ;;  %v325_v47 = vmul.f32 %v261_v35, %v2001_v49  ;;  %v262_v28 = vmul.f32 %v2007_v10, %v2007_v10 }
  0xd1   : > { %v701_v37 = vmul.f32 0.5, %v637_v7  ;;  %v1235_v38 = vpop.eup %1234  ;;  %955 = vst [vmem:[%s1614_s17 + $0x188] sm:$0xff] %v891_v40  ;;  %v638_v39 = vadd.f32 1.0, %v1233_v20  ;;  %v451_v45 = vadd.f32 %v387_v11, %v1987_v44  ;;  %v263_v24 = vmul.f32 %v2013_v30, %v2013_v30 }
  0xd2   : > { %v452_v12 = vadd.f32 %v388_v32, %v1990_v48  ;;  %v828_v52 = vmul.f32 2.0, %v764_v8  ;;  %v639_v42 = vadd.f32 1.0, %v1235_v38  ;;  %v389_v50 = vmul.f32 0.044715, %v325_v47 }
  0xd3   : > { %v765_v2 = vmul.f32 %v701_v37, %v1931_v54  ;;  %v702_v33 = vmul.f32 0.5, %v638_v39  ;;  %v515_v56 = vmul.f32 0.7978846, %v451_v45  ;;  %v326_v57 = vmul.f32 %v262_v28, %v2007_v10 }
  0xd4   : > { %v1237_v53 = vpop.eup %1236  ;;  %v516_v17 = vmul.f32 0.7978846, %v452_v12  ;;  %v892_v36 = vadd.f32 1.0, %v828_v52  ;;  %v703_v61 = vmul.f32 0.5, %v639_v42  ;;  %v453_v54 = vadd.f32 %v389_v50, %v2001_v49 }
  0xd5   : > { %v829_v60 = vmul.f32 2.0, %v765_v2  ;;  %v640_v59 = vadd.f32 1.0, %v1237_v53  ;;  %v766_v18 = vmul.f32 %v702_v33, %v1941_v58  ;;  %1242 = vtanh.f32 %v515_v56 }
  0xd6   : > { %v390_v3 = vmul.f32 0.044715, %v326_v57  ;;  %v1239_v21 = vpop.eup %1238  ;;  %956 = vst [vmem:[%s1614_s17 + $0x190] sm:$0xff] %v892_v36  ;;  %v767_v46 = vmul.f32 %v703_v61, %v1945_v62  ;;  %1244 = vtanh.f32 %v516_v17  ;;  %v517_v23 = vmul.f32 0.7978846, %v453_v54 }
  0xd7   : > { %v893_v4 = vadd.f32 1.0, %v829_v60  ;;  %v704_v16 = vmul.f32 0.5, %v640_v59  ;;  %v830_v55 = vmul.f32 2.0, %v766_v18  ;;  %v641_v31 = vadd.f32 1.0, %v1239_v21 }
  0xd8   : > { %v454_v51 = vadd.f32 %v390_v3, %v2007_v10  ;;  %v831_v58 = vmul.f32 2.0, %v767_v46  ;;  %v327_v14 = vmul.f32 %v263_v24, %v2013_v30  ;;  %v264_v0 = vmul.f32 %v2030_v5, %v2030_v5 }
  0xd9   : > { %957 = vst [vmem:[%s1614_s17 + $0x198] sm:$0xff] %v893_v4  ;;  %v768_v43 = vmul.f32 %v704_v16, %v1949_v9  ;;  %v1241_v62 = vpop.eup %1240  ;;  %v894_v34 = vadd.f32 1.0, %v830_v55  ;;  %v705_v1 = vmul.f32 0.5, %v641_v31  ;;  %1246 = vtanh.f32 %v517_v23 }
  0xda   : > { %v518_v25 = vmul.f32 0.7978846, %v454_v51  ;;  %v895_v26 = vadd.f32 1.0, %v831_v58  ;;  %v642_v13 = vadd.f32 1.0, %v1241_v62  ;;  %v391_v29 = vmul.f32 0.044715, %v327_v14 }
  0xdb   : > { %v832_v6 = vmul.f32 2.0, %v768_v43  ;;  %958 = vst [vmem:[%s1614_s17 + $0x1a0] sm:$0xff] %v894_v34  ;;  %v769_v9 = vmul.f32 %v705_v1, %v1955_v15  ;;  %v328_v63 = vmul.f32 %v264_v0, %v2030_v5  ;;  %v265_v27 = vmul.f32 %v2041_v19, %v2041_v19 }
  0xdc   : > { %1248 = vtanh.f32 %v518_v25  ;;  %959 = vst [vmem:[%s1614_s17 + $0x1a8] sm:$0xff] %v895_v26  ;;  %v706_v7 = vmul.f32 0.5, %v642_v13  ;;  %v455_v35 = vadd.f32 %v391_v29, %v2013_v30 }
  0xdd   : > { %v896_v22 = vadd.f32 1.0, %v832_v6  ;;  %v833_v40 = vmul.f32 2.0, %v769_v9  ;;  %v392_v11 = vmul.f32 0.044715, %v328_v63  ;;  %v329_v32 = vmul.f32 %v265_v27, %v2041_v19 }
  0xde   : > { %v770_v20 = vmul.f32 %v706_v7, %v1961_v41  ;;  %v519_v15 = vmul.f32 0.7978846, %v455_v35 }
  0xdf   : > { %960 = vst [vmem:[%s1614_s17 + $0x1b0] sm:$0xff] %v896_v22  ;;  %v1243_v8 = vpop.eup %1242  ;;  %v897_v37 = vadd.f32 1.0, %v833_v40  ;;  %v456_v47 = vadd.f32 %v392_v11, %v2030_v5  ;;  %v393_v28 = vmul.f32 0.044715, %v329_v32 }
  0xe0   : > { %v1245_v38 = vpop.eup %1244  ;;  %v834_v39 = vmul.f32 2.0, %v770_v20  ;;  %v643_v45 = vadd.f32 1.0, %v1243_v8  ;;  %1250 = vtanh.f32 %v519_v15 }
  0xe1   : > { %961 = vst [vmem:[%s1614_s17 + $0x1b8] sm:$0xff] %v897_v37  ;;  %v644_v12 = vadd.f32 1.0, %v1245_v38  ;;  %v520_v24 = vmul.f32 0.7978846, %v456_v47  ;;  %v457_v52 = vadd.f32 %v393_v28, %v2041_v19 }
  0xe2   : > { %v898_v2 = vadd.f32 1.0, %v834_v39  ;;  %v707_v42 = vmul.f32 0.5, %v643_v45 }
  0xe3   : > { %v1247_v50 = vpop.eup %1246  ;;  %v708_v41 = vmul.f32 0.5, %v644_v12  ;;  %1252 = vtanh.f32 %v520_v24  ;;  %v521_v53 = vmul.f32 0.7978846, %v457_v52 }
  0xe4   : > { %962 = vst [vmem:[%s1614_s17 + $0x1c0] sm:$0xff] %v898_v2  ;;  %v771_v33 = vmul.f32 %v707_v42, %v1987_v44  ;;  %v645_v56 = vadd.f32 1.0, %v1247_v50 }
  0xe5   : > { %v772_v57 = vmul.f32 %v708_v41, %v1990_v48  ;;  %1254 = vtanh.f32 %v521_v53 }
  0xe6   : > { %v1249_v17 = vpop.eup %1248  ;;  %v835_v36 = vmul.f32 2.0, %v771_v33  ;;  %v709_v60 = vmul.f32 0.5, %v645_v56 }
  0xe7   : > { %v646_v61 = vadd.f32 1.0, %v1249_v17  ;;  %v836_v59 = vmul.f32 2.0, %v772_v57 }
  0xe8   : > { %v899_v18 = vadd.f32 1.0, %v835_v36  ;;  %v773_v54 = vmul.f32 %v709_v60, %v2001_v49 }
  0xe9   : > { %v710_v3 = vmul.f32 0.5, %v646_v61  ;;  %v900_v21 = vadd.f32 1.0, %v836_v59 }
  0xea   : > { %v1251_v4 = vpop.eup %1250  ;;  %963 = vst [vmem:[%s1614_s17 + $0x1c8] sm:$0xff] %v899_v18  ;;  %v837_v44 = vmul.f32 2.0, %v773_v54 }
  0xeb   : > { %v774_v46 = vmul.f32 %v710_v3, %v2007_v10  ;;  %964 = vst [vmem:[%s1614_s17 + $0x1d0] sm:$0xff] %v900_v21  ;;  %v647_v16 = vadd.f32 1.0, %v1251_v4 }
  0xec   : > { %v901_v48 = vadd.f32 1.0, %v837_v44 }
  0xed   : > { %v838_v55 = vmul.f32 2.0, %v774_v46  ;;  %v1253_v31 = vpop.eup %1252  ;;  %v711_v23 = vmul.f32 0.5, %v647_v16 }
  0xee   : > { %965 = vst [vmem:[%s1614_s17 + $0x1d8] sm:$0xff] %v901_v48  ;;  %v648_v49 = vadd.f32 1.0, %v1253_v31 }
  0xef   : > { %v902_v51 = vadd.f32 1.0, %v838_v55  ;;  %v1255_v58 = vpop.eup %1254  ;;  %v775_v43 = vmul.f32 %v711_v23, %v2013_v30 }
  0xf0   : > { %v712_v14 = vmul.f32 0.5, %v648_v49  ;;  %v649_v0 = vadd.f32 1.0, %v1255_v58 }
  0xf1   : > { %966 = vst [vmem:[%s1614_s17 + $0x1e0] sm:$0xff] %v902_v51  ;;  %v839_v10 = vmul.f32 2.0, %v775_v43 }
  0xf2   : > { %v776_v62 = vmul.f32 %v712_v14, %v2030_v5  ;;  %v713_v34 = vmul.f32 0.5, %v649_v0 }
  0xf3   : > { %v903_v1 = vadd.f32 1.0, %v839_v10 }
  0xf4   : > { %v840_v25 = vmul.f32 2.0, %v776_v62  ;;  %v777_v26 = vmul.f32 %v713_v34, %v2041_v19 }
  0xf5   : > { %967 = vst [vmem:[%s1614_s17 + $0x1e8] sm:$0xff] %v903_v1 }
  0xf6   : > { %v904_v6 = vadd.f32 1.0, %v840_v25  ;;  %v841_v30 = vmul.f32 2.0, %v777_v26 }
  0xf8   : > { %968 = vst [vmem:[%s1614_s17 + $0x1f0] sm:$0xff] %v904_v6  ;;  %v905_v5 = vadd.f32 1.0, %v841_v30 }
  0xfa   : > { %969 = vst [vmem:[%s1614_s17 + $0x1f8] sm:$0xff] %v905_v5 }
  0xfb   : > { %1299 = shalt.err (!%p1296_p1)
}
  0xfc   : > { %s1300_s13 = scalar_lea.hbm %s2074_s2, 8192  ;;  %s1304_s20 = scalar_lea.hbm %s2122_s1, 32768 }
  0xfd   : > { %p1301_p3 = scmp.ne.s32.totalorder %s2074_s2, %s1300_s13  ;;  %p1305_p0 = scmp.lt.u32.totalorder %s2074_s2, %s2122_s1 }
  0xfe   : > { %p1306_p2 = scmp.lt.u32.totalorder %s1304_s20, %s1300_s13  ;;  %p1308_p6 = scmp.lt.u32.totalorder %s1300_s13, %s2074_s2 }
  0xff   : > { %p1302_p4 = pnand %p1301_p3, %p2129_p10 }
 0x100   : > { %p1307_p7 = por %p1306_p2, %p1305_p0 }
 0x101   : > { %p1303_p5 = pneg %p1302_p4 }
 0x102   : > { %p1309_p11 = por %p1308_p6, %p1307_p7 }
 0x104   : > { %p1310_p12 = pnand %p1309_p11, %p1303_p5 }
 0x106   : > { %1313 = shalt.err (!%p1310_p12)
}
 0x107   : > { %s1358_s24 = smov 1024   ;;  %s1359_s26 = smov 64  }
 0x108   : > { %1080 = dma.vmem_to_hbm [thread:$0]  (%p2129_p10), %s2076_s27, 8192, %s2074_s2, %s971_s3, %s1358_s24, %s1358_s24, %s1359_s26  }
 0x109 PF: > { %p1091_p8 = scmp.ge.s32.totalorder %s1352_s9, 2  ;;  %s1000_s30 = sand.u32 1, %s1340_s6  }
 0x10a   : > { %p2130_p9 = scmp.ne.s32.totalorder %s2127_s19, 0  ;;  %s1001_s17 = scalar_lea.sflag [#allocation4], %s1000_s30 }
 0x10c   : > { %p1087_p13 = pnand %p1091_p8, %p2130_p9 }
 0x10e   : > { %1335 = dma.done.wait (!%p1087_p13), %s1001_s17, 8192  }
 0x10f   : > { %1337 = vsyncadd (!%p1087_p13), %s1001_s17, 4294959104  ;;  %p14_p1 = scmp.ge.s32.totalorder %s1395_s12, 6   ;;  %s2131_s6 = smov %s1344_s7 }
 0x110   : > { %s2132_s7 = smov %s1348_s8  ;;  %s2133_s8 = smov %s1407_s15 }
 0x111   : > { %s2134_s9 = smov %s1395_s12  ;;  %16 = sbr.rel (!%p14_p1) target bundleno = 5 (0x5), region = 69 }
 0x118   :  { %1006 = vsyncpa [#allocation3], 1 }
 0x119   :  { %1008 = vsyncpa [#allocation3 + $0x1], 1 }
 0x11a   :  { %1009 = vsyncpa [#allocation4], 1 }
 0x11b   :  { %1011 = vsyncpa [#allocation4 + $0x1], 1 }

</bundles_post_ra>
